<compile_context>
chip_gen: v6e
topology: v6e:2x2x1
jax: 0.10.0
libtpu: 0.0.40
codegen_flags: <defaults>
</compile_context>

<pallas_src>
import jax
import jax.numpy as jnp
from jax.experimental import pallas as pl
from jax.experimental.pallas import tpu as pltpu

IN_FEATURES = 3072
OUT_FEATURES = 10
MAX_TM = 1024        # batch-tile cap: 2 * 1024 * 3072 * 4B = 24 MiB of x buffers


def _round_up(v, m):
    return ((v + m - 1) // m) * m


def _select_tm(B):
    """Pick the batch tile size.

    - Tiny batch (B <= 8): one block equal to the full batch dim (a block dim
      equal to the array dim is legal even if not a multiple of 8).
    - Otherwise: at least 2 grid steps (so v7x's two TensorCores both get
      work), rounded to the 8-row sublane granule and capped for VMEM.
    """
    if B <= 8:
        return B
    half = -(-B // 2)  # cdiv(B, 2)
    return min(MAX_TM, _round_up(half, 8))


def linear_kernel(x_ref, w_ref, b_ref, o_ref):
    """o = x @ w + b for one batch tile, full K in a single MXU pass."""
    o_ref[...] = (
        jnp.dot(x_ref[...], w_ref[...], preferred_element_type=jnp.float32)
        + b_ref[...]
    ).astype(o_ref.dtype)


def tudui_forward(x, w_t, b):
    """x: [B, 3072] f32, w_t: [3072, 10] f32, b: [1, 10] f32 -> [B, 10] f32."""
    B, K = x.shape
    assert K == IN_FEATURES
    N = w_t.shape[1]

    TM = _select_tm(B)
    grid = (pl.cdiv(B, TM),)  # ragged last block is fine: OOB stores are masked

    cost = pl.CostEstimate(
        flops=2 * B * K * N,
        transcendentals=0,
        bytes_accessed=(B * K + K * N + N + B * N) * 4,
    )

    return pl.pallas_call(
        linear_kernel,
        out_shape=jax.ShapeDtypeStruct((B, N), x.dtype),
        grid=grid,
        in_specs=[
            pl.BlockSpec((TM, K), lambda i: (i, 0)),   # x batch tile, full K
            pl.BlockSpec((K, N), lambda i: (0, 0)),    # full weight (grid-invariant)
            pl.BlockSpec((1, N), lambda i: (0, 0)),    # bias (grid-invariant)
        ],
        out_specs=pl.BlockSpec((TM, N), lambda i: (i, 0)),
        compiler_params=pltpu.CompilerParams(
            dimension_semantics=("parallel",),
            vmem_limit_bytes=48 * 1024 * 1024,
        ),
        cost_estimate=cost,
    )(x, w_t, b)


def init_params(key):
    """Deterministic init matching nn.Linear(3072, 10) shapes & scheme
    (uniform in [-1/sqrt(fan_in), 1/sqrt(fan_in)])."""
    kw, kb = jax.random.split(key)
    bound = 1.0 / (IN_FEATURES ** 0.5)
    # PyTorch stores weight as [out, in]; we keep the transposed [in, out]
    # layout so the kernel does x @ w_t directly.
    w_t = jax.random.uniform(
        kw, (IN_FEATURES, OUT_FEATURES), jnp.float32, -bound, bound
    )
    b = jax.random.uniform(
        kb, (1, OUT_FEATURES), jnp.float32, -bound, bound
    )
    return w_t, b


if __name__ == "__main__":
    key = jax.random.PRNGKey(0)
    k_x, k_p = jax.random.split(key)

    B = 8  # small batch (flattened 3*32*32 CIFAR image per row)
    x = jax.random.normal(k_x, (B, IN_FEATURES), jnp.float32)
    w_t, b = init_params(k_p)

    out = tudui_forward(x, w_t, b)
    out = jax.block_until_ready(out)

    # Reference check against plain JAX (same math as torch Linear forward).
    ref = x @ w_t + b
    assert out.shape == (B, OUT_FEATURES)
    assert jnp.allclose(out, ref, atol=1e-4, rtol=1e-4)

    print("KERNEL_OK")
</pallas_src>

<mosaic_0001>
module attributes {stable_mosaic.version = 11 : i64} {
  func.func @linear_kernel(%arg0: i32, %arg1: memref<8x3072xf32, #tpu.memory_space<vmem>>, %arg2: memref<3072x10xf32, #tpu.memory_space<vmem>>, %arg3: memref<1x10xf32, #tpu.memory_space<vmem>>, %arg4: memref<8x10xf32, #tpu.memory_space<vmem>>) attributes {dimension_semantics = [#tpu.dimension_semantics<parallel>], iteration_bounds = array<i64: 1>, scalar_prefetch = 0 : i64, scratch_operands = 0 : i64, tpu.core_type = #tpu.core_type<tc>, window_params = [{transform_indices = @transform_0, window_bounds = array<i64: 8, 3072>}, {pipeline_mode = #tpu.pipeline_mode<synchronous>, transform_indices = @transform_1, window_bounds = array<i64: 3072, 10>}, {pipeline_mode = #tpu.pipeline_mode<synchronous>, transform_indices = @transform_2, window_bounds = array<i64: 1, 10>}, {transform_indices = @transform_3, window_bounds = array<i64: 8, 10>}]} {
    %c0 = arith.constant 0 : index
    %c0_0 = arith.constant 0 : index
    %0 = vector.load %arg1[%c0, %c0_0] : memref<8x3072xf32, #tpu.memory_space<vmem>>, vector<8x3072xf32>
    %c0_1 = arith.constant 0 : index
    %c0_2 = arith.constant 0 : index
    %1 = vector.load %arg2[%c0_1, %c0_2] : memref<3072x10xf32, #tpu.memory_space<vmem>>, vector<3072x10xf32>
    %cst = arith.constant dense<0.000000e+00> : vector<8x10xf32>
    %2 = tpu.matmul %0, %1, %cst {dimension_numbers = #tpu.dot_dimension_numbers<[1], [0], [0], [1], [0, 0, 1, 1], [], []>} : vector<8x3072xf32>, vector<3072x10xf32>, vector<8x10xf32> -> vector<8x10xf32>
    %c0_3 = arith.constant 0 : index
    %c0_4 = arith.constant 0 : index
    %3 = vector.load %arg3[%c0_3, %c0_4] : memref<1x10xf32, #tpu.memory_space<vmem>>, vector<1x10xf32>
    %4 = vector.broadcast %3 : vector<1x10xf32> to vector<8x10xf32>
    %5 = arith.addf %2, %4 : vector<8x10xf32>
    %c0_5 = arith.constant 0 : index
    %c0_6 = arith.constant 0 : index
    %6 = vector.load %arg4[%c0_5, %c0_6] : memref<8x10xf32, #tpu.memory_space<vmem>>, vector<8x10xf32>
    tpu.vector_store %arg4[%c0_5, %c0_6], %5 {strides = array<i32>} : memref<8x10xf32, #tpu.memory_space<vmem>>, vector<8x10xf32>,
    return
  }
  func.func @transform_0(%arg0: i32) -> (i32, i32) {
    %c0_i32 = arith.constant 0 : i32
    %c0_i32_0 = arith.constant 0 : i32
    return %arg0, %c0_i32 : i32, i32
  }
  func.func @transform_1(%arg0: i32) -> (i32, i32) {
    %c0_i32 = arith.constant 0 : i32
    %c0_i32_0 = arith.constant 0 : i32
    %c0_i32_1 = arith.constant 0 : i32
    return %c0_i32, %c0_i32_0 : i32, i32
  }
  func.func @transform_2(%arg0: i32) -> (i32, i32) {
    %c0_i32 = arith.constant 0 : i32
    %c0_i32_0 = arith.constant 0 : i32
    %c0_i32_1 = arith.constant 0 : i32
    return %c0_i32, %c0_i32_0 : i32, i32
  }
  func.func @transform_3(%arg0: i32) -> (i32, i32) {
    %c0_i32 = arith.constant 0 : i32
    %c0_i32_0 = arith.constant 0 : i32
    return %arg0, %c0_i32 : i32, i32
  }
}

</mosaic_0001>

<bundles_post_ra>
// kernel: tpu_custom_call.1
= control target key start
LH: loop header
LB: loop body
LE: loop exit
PB: predicated region body
PF: predicated region fallthrough
CT: control target
= control target key end

     0   :  { %s2981_s0 = inlined_call_operand.vmem [shape: f32[8,3072], index: 0, kind: input, shape index: {}]   ;;  %s2982_s1 = inlined_call_operand.vmem [shape: f32[3072,10], index: 1, kind: input, shape index: {}]   ;;  %s2983_s2 = inlined_call_operand.vmem [shape: f32[1,10], index: 2, kind: input, shape index: {}]   ;;  %s2984_s3 = inlined_call_operand.hbm [shape: f32[8,10], index: 3, kind: output, shape index: {}]  }
   0x1   :  { %v70_v0 = vld [vmem:[%s2982_s1 + $0xf8] sm:$0xff]  ;;  %v69_v4 = vld [vmem:[%s2982_s1 + $0xf0] sm:$0xff]  ;;  %v68_v8 = vld [vmem:[%s2982_s1 + $0xe8] sm:$0xff] }
   0x2   :  { %v102_v1 = vld [vmem:[%s2982_s1 + $0x1f8] sm:$0xff]  ;;  %1287 = vmatprep.subr.mxu0 %v70_v0  ;;  %v101_v5 = vld [vmem:[%s2982_s1 + $0x1f0] sm:$0xff]  ;;  %v100_v9 = vld [vmem:[%s2982_s1 + $0x1e8] sm:$0xff] }
   0x3   :  { %v54_v2 = vld [vmem:[%s2982_s1 + $0x78] sm:$0xff]  ;;  %1322 = vmatprep.subr.mxu1 %v102_v1  ;;  %v53_v6 = vld [vmem:[%s2982_s1 + $0x70] sm:$0xff]  ;;  %v52_v10 = vld [vmem:[%s2982_s1 + $0x68] sm:$0xff] }
   0x4   :  { %v86_v3 = vld [vmem:[%s2982_s1 + $0x178] sm:$0xff]  ;;  %1288 = vmatpush3.msra.mxu0 %v54_v2  ;;  %v85_v7 = vld [vmem:[%s2982_s1 + $0x170] sm:$0xff]  ;;  %v84_v11 = vld [vmem:[%s2982_s1 + $0x168] sm:$0xff] }
   0x5   :  { %1323 = vmatpush3.msra.mxu1 %v86_v3  ;;  %1289 = vmatprep.subr.mxu0 %v69_v4  ;;  %v67_v12 = vld [vmem:[%s2982_s1 + $0xe0] sm:$0xff]  ;;  %v66_v16 = vld [vmem:[%s2982_s1 + $0xd8] sm:$0xff]  ;;  %v65_v20 = vld [vmem:[%s2982_s1 + $0xd0] sm:$0xff] }
   0x6   :  { %1324 = vmatprep.subr.mxu1 %v101_v5  ;;  %1290 = vmatpush3.msra.mxu0 %v53_v6  ;;  %v99_v13 = vld [vmem:[%s2982_s1 + $0x1e0] sm:$0xff]  ;;  %v98_v17 = vld [vmem:[%s2982_s1 + $0x1d8] sm:$0xff]  ;;  %v97_v21 = vld [vmem:[%s2982_s1 + $0x1d0] sm:$0xff] }
   0x7   :  { %1325 = vmatpush3.msra.mxu1 %v85_v7  ;;  %1291 = vmatprep.subr.mxu0 %v68_v8  ;;  %v51_v14 = vld [vmem:[%s2982_s1 + $0x60] sm:$0xff]  ;;  %v50_v18 = vld [vmem:[%s2982_s1 + $0x58] sm:$0xff]  ;;  %v49_v22 = vld [vmem:[%s2982_s1 + $0x50] sm:$0xff] }
   0x8   :  { %1326 = vmatprep.subr.mxu1 %v100_v9  ;;  %v83_v15 = vld [vmem:[%s2982_s1 + $0x160] sm:$0xff]  ;;  %1292 = vmatpush3.msra.mxu0 %v52_v10  ;;  %v82_v19 = vld [vmem:[%s2982_s1 + $0x158] sm:$0xff]  ;;  %v81_v23 = vld [vmem:[%s2982_s1 + $0x150] sm:$0xff] }
   0x9   :  { %1327 = vmatpush3.msra.mxu1 %v84_v11  ;;  %1293 = vmatprep.subr.mxu0 %v67_v12  ;;  %v64_v24 = vld [vmem:[%s2982_s1 + $0xc8] sm:$0xff]  ;;  %v63_v28 = vld [vmem:[%s2982_s1 + $0xc0] sm:$0xff]  ;;  %v62_v32 = vld [vmem:[%s2982_s1 + $0xb8] sm:$0xff] }
   0xa   :  { %1328 = vmatprep.subr.mxu1 %v99_v13  ;;  %1294 = vmatpush3.msra.mxu0 %v51_v14  ;;  %v96_v25 = vld [vmem:[%s2982_s1 + $0x1c8] sm:$0xff]  ;;  %v95_v29 = vld [vmem:[%s2982_s1 + $0x1c0] sm:$0xff]  ;;  %v94_v33 = vld [vmem:[%s2982_s1 + $0x1b8] sm:$0xff] }
   0xb   :  { %1329 = vmatpush3.msra.mxu1 %v83_v15  ;;  %1295 = vmatprep.subr.mxu0 %v66_v16  ;;  %v48_v26 = vld [vmem:[%s2982_s1 + $0x48] sm:$0xff]  ;;  %v47_v30 = vld [vmem:[%s2982_s1 + $0x40] sm:$0xff]  ;;  %v46_v34 = vld [vmem:[%s2982_s1 + $0x38] sm:$0xff] }
   0xc   :  { %1330 = vmatprep.subr.mxu1 %v98_v17  ;;  %1296 = vmatpush3.msra.mxu0 %v50_v18  ;;  %v80_v27 = vld [vmem:[%s2982_s1 + $0x148] sm:$0xff]  ;;  %v79_v31 = vld [vmem:[%s2982_s1 + $0x140] sm:$0xff]  ;;  %v78_v35 = vld [vmem:[%s2982_s1 + $0x138] sm:$0xff] }
   0xd   :  { %1331 = vmatpush3.msra.mxu1 %v82_v19  ;;  %1297 = vmatprep.subr.mxu0 %v65_v20  ;;  %v61_v36 = vld [vmem:[%s2982_s1 + $0xb0] sm:$0xff]  ;;  %v60_v40 = vld [vmem:[%s2982_s1 + $0xa8] sm:$0xff]  ;;  %v59_v44 = vld [vmem:[%s2982_s1 + $0xa0] sm:$0xff] }
   0xe   :  { %1332 = vmatprep.subr.mxu1 %v97_v21  ;;  %1298 = vmatpush3.msra.mxu0 %v49_v22  ;;  %v93_v37 = vld [vmem:[%s2982_s1 + $0x1b0] sm:$0xff]  ;;  %v92_v41 = vld [vmem:[%s2982_s1 + $0x1a8] sm:$0xff]  ;;  %v91_v45 = vld [vmem:[%s2982_s1 + $0x1a0] sm:$0xff] }
   0xf   :  { %1333 = vmatpush3.msra.mxu1 %v81_v23  ;;  %1299 = vmatprep.subr.mxu0 %v64_v24  ;;  %v45_v38 = vld [vmem:[%s2982_s1 + $0x30] sm:$0xff]  ;;  %v44_v42 = vld [vmem:[%s2982_s1 + $0x28] sm:$0xff]  ;;  %v43_v46 = vld [vmem:[%s2982_s1 + $0x20] sm:$0xff] }
  0x10   :  { %1334 = vmatprep.subr.mxu1 %v96_v25  ;;  %1300 = vmatpush3.msra.mxu0 %v48_v26  ;;  %v77_v39 = vld [vmem:[%s2982_s1 + $0x130] sm:$0xff]  ;;  %v76_v43 = vld [vmem:[%s2982_s1 + $0x128] sm:$0xff]  ;;  %v75_v47 = vld [vmem:[%s2982_s1 + $0x120] sm:$0xff] }
  0x11   :  { %1335 = vmatpush3.msra.mxu1 %v80_v27  ;;  %1301 = vmatprep.subr.mxu0 %v63_v28  ;;  %v58_v48 = vld [vmem:[%s2982_s1 + $0x98] sm:$0xff]  ;;  %v57_v52 = vld [vmem:[%s2982_s1 + $0x90] sm:$0xff]  ;;  %v56_v56 = vld [vmem:[%s2982_s1 + $0x88] sm:$0xff] }
  0x12   :  { %1336 = vmatprep.subr.mxu1 %v95_v29  ;;  %1302 = vmatpush3.msra.mxu0 %v47_v30  ;;  %v90_v49 = vld [vmem:[%s2982_s1 + $0x198] sm:$0xff]  ;;  %v89_v53 = vld [vmem:[%s2982_s1 + $0x190] sm:$0xff]  ;;  %v88_v57 = vld [vmem:[%s2982_s1 + $0x188] sm:$0xff] }
  0x13   :  { %1337 = vmatpush3.msra.mxu1 %v79_v31  ;;  %1303 = vmatprep.subr.mxu0 %v62_v32  ;;  %v42_v50 = vld [vmem:[%s2982_s1 + $0x18] sm:$0xff]  ;;  %v41_v54 = vld [vmem:[%s2982_s1 + $0x10] sm:$0xff]  ;;  %v40_v58 = vld [vmem:[%s2982_s1 + $0x8] sm:$0xff] }
  0x14   :  { %1338 = vmatprep.subr.mxu1 %v94_v33  ;;  %1304 = vmatpush3.msra.mxu0 %v46_v34  ;;  %v74_v51 = vld [vmem:[%s2982_s1 + $0x118] sm:$0xff]  ;;  %v73_v55 = vld [vmem:[%s2982_s1 + $0x110] sm:$0xff]  ;;  %v72_v59 = vld [vmem:[%s2982_s1 + $0x108] sm:$0xff] }
  0x15   :  { %1339 = vmatpush3.msra.mxu1 %v78_v35  ;;  %1305 = vmatprep.subr.mxu0 %v61_v36  ;;  %v55_v60 = vld [vmem:[%s2982_s1 + $0x80] sm:$0xff]  ;;  %v16_v63 = vld [vmem:[%s2981_s0 + $0x8] sm:$0xff]  ;;  %v18_v2 = vld [vmem:[%s2981_s0 + $0x18] sm:$0xff] }
  0x16   :  { %1340 = vmatprep.subr.mxu1 %v93_v37  ;;  %1306 = vmatpush3.msra.mxu0 %v45_v38  ;;  %v87_v61 = vld [vmem:[%s2982_s1 + $0x180] sm:$0xff]  ;;  %v134_v3 = vld [vmem:[%s2982_s1 + $0x2f8] sm:$0xff]  ;;  %v17_v5 = vld [vmem:[%s2981_s0 + $0x10] sm:$0xff] }
  0x17   :  { %1341 = vmatpush3.msra.mxu1 %v77_v39  ;;  %1307 = vmatprep.subr.mxu0 %v60_v40  ;;  %v39_v62 = vld [vmem:[%s2982_s1] sm:$0xff]  ;;  %v166_v4 = vld [vmem:[%s2982_s1 + $0x3f8] sm:$0xff]  ;;  %v133_v8 = vld [vmem:[%s2982_s1 + $0x2f0] sm:$0xff] }
  0x18   :  { %1342 = vmatprep.subr.mxu1 %v92_v41  ;;  %1308 = vmatpush3.msra.mxu0 %v44_v42  ;;  %v71_v0 = vld [vmem:[%s2982_s1 + $0x100] sm:$0xff]  ;;  %v118_v6 = vld [vmem:[%s2982_s1 + $0x278] sm:$0xff]  ;;  %v165_v9 = vld [vmem:[%s2982_s1 + $0x3f0] sm:$0xff] }
  0x19   :  { %1343 = vmatpush3.msra.mxu1 %v76_v43  ;;  %1309 = vmatprep.subr.mxu0 %v59_v44  ;;  %v15_v1 = vld [vmem:[%s2981_s0] sm:$0xff]  ;;  %v150_v7 = vld [vmem:[%s2982_s1 + $0x378] sm:$0xff]  ;;  %v117_v10 = vld [vmem:[%s2982_s1 + $0x270] sm:$0xff] }
  0x1a   :  { %1344 = vmatprep.subr.mxu1 %v91_v45  ;;  %1310 = vmatpush3.msra.mxu0 %v43_v46  ;;  %v149_v11 = vld [vmem:[%s2982_s1 + $0x370] sm:$0xff]  ;;  %v132_v12 = vld [vmem:[%s2982_s1 + $0x2e8] sm:$0xff]  ;;  %v131_v16 = vld [vmem:[%s2982_s1 + $0x2e0] sm:$0xff] }
  0x1b   :  { %1345 = vmatpush3.msra.mxu1 %v75_v47  ;;  %1311 = vmatprep.subr.mxu0 %v58_v48  ;;  %v164_v13 = vld [vmem:[%s2982_s1 + $0x3e8] sm:$0xff]  ;;  %v163_v17 = vld [vmem:[%s2982_s1 + $0x3e0] sm:$0xff]  ;;  %v130_v20 = vld [vmem:[%s2982_s1 + $0x2d8] sm:$0xff] }
  0x1c   :  { %1346 = vmatprep.subr.mxu1 %v90_v49  ;;  %1312 = vmatpush3.msra.mxu0 %v42_v50  ;;  %v116_v14 = vld [vmem:[%s2982_s1 + $0x268] sm:$0xff]  ;;  %v115_v18 = vld [vmem:[%s2982_s1 + $0x260] sm:$0xff]  ;;  %v162_v21 = vld [vmem:[%s2982_s1 + $0x3d8] sm:$0xff] }
  0x1d   :  { %1347 = vmatpush3.msra.mxu1 %v74_v51  ;;  %1313 = vmatprep.subr.mxu0 %v57_v52  ;;  %v148_v15 = vld [vmem:[%s2982_s1 + $0x368] sm:$0xff]  ;;  %v147_v19 = vld [vmem:[%s2982_s1 + $0x360] sm:$0xff]  ;;  %v114_v22 = vld [vmem:[%s2982_s1 + $0x258] sm:$0xff] }
  0x1e   :  { %1348 = vmatprep.subr.mxu1 %v89_v53  ;;  %1314 = vmatpush3.msra.mxu0 %v41_v54  ;;  %v146_v23 = vld [vmem:[%s2982_s1 + $0x358] sm:$0xff]  ;;  %v129_v24 = vld [vmem:[%s2982_s1 + $0x2d0] sm:$0xff]  ;;  %v128_v28 = vld [vmem:[%s2982_s1 + $0x2c8] sm:$0xff] }
  0x1f   :  { %1349 = vmatpush3.msra.mxu1 %v73_v55  ;;  %1315 = vmatprep.subr.mxu0 %v56_v56  ;;  %v161_v25 = vld [vmem:[%s2982_s1 + $0x3d0] sm:$0xff]  ;;  %v160_v29 = vld [vmem:[%s2982_s1 + $0x3c8] sm:$0xff]  ;;  %v127_v32 = vld [vmem:[%s2982_s1 + $0x2c0] sm:$0xff] }
  0x20   :  { %1350 = vmatprep.subr.mxu1 %v88_v57  ;;  %1316 = vmatpush3.msra.mxu0 %v40_v58  ;;  %v113_v26 = vld [vmem:[%s2982_s1 + $0x250] sm:$0xff]  ;;  %v112_v30 = vld [vmem:[%s2982_s1 + $0x248] sm:$0xff]  ;;  %v159_v33 = vld [vmem:[%s2982_s1 + $0x3c0] sm:$0xff] }
  0x21   :  { %1351 = vmatpush3.msra.mxu1 %v72_v59  ;;  %1317 = vmatprep.subr.mxu0 %v55_v60  ;;  %v145_v27 = vld [vmem:[%s2982_s1 + $0x350] sm:$0xff]  ;;  %v144_v31 = vld [vmem:[%s2982_s1 + $0x348] sm:$0xff]  ;;  %v111_v34 = vld [vmem:[%s2982_s1 + $0x240] sm:$0xff] }
  0x22   :  { %1352 = vmatprep.subr.mxu1 %v87_v61  ;;  %1318 = vmatpush3.msra.mxu0 %v39_v62  ;;  %v143_v35 = vld [vmem:[%s2982_s1 + $0x340] sm:$0xff]  ;;  %v126_v36 = vld [vmem:[%s2982_s1 + $0x2b8] sm:$0xff]  ;;  %v125_v40 = vld [vmem:[%s2982_s1 + $0x2b0] sm:$0xff] }
  0x23   :  { %494 = vmatprep.mubr.f32.mxu0 %v16_v63  ;;  %1353 = vmatpush3.msra.mxu1 %v71_v0  ;;  %v158_v37 = vld [vmem:[%s2982_s1 + $0x3b8] sm:$0xff]  ;;  %v157_v41 = vld [vmem:[%s2982_s1 + $0x3b0] sm:$0xff]  ;;  %v124_v44 = vld [vmem:[%s2982_s1 + $0x2a8] sm:$0xff] }
  0x24   :  { %495 = vmatmul.mubr.f32.vlgmr.msra.gmra.mxu0 %v15_v1  ;;  %564 = vmatprep.mubr.f32.mxu1 %v18_v2  ;;  %v110_v38 = vld [vmem:[%s2982_s1 + $0x238] sm:$0xff]  ;;  %v109_v42 = vld [vmem:[%s2982_s1 + $0x230] sm:$0xff]  ;;  %v156_v45 = vld [vmem:[%s2982_s1 + $0x3a8] sm:$0xff] }
  0x25   :  { %1357 = vmatprep.subr.mxu0 %v134_v3  ;;  %1392 = vmatprep.subr.mxu1 %v166_v4  ;;  %v142_v39 = vld [vmem:[%s2982_s1 + $0x338] sm:$0xff]  ;;  %v141_v43 = vld [vmem:[%s2982_s1 + $0x330] sm:$0xff]  ;;  %v108_v46 = vld [vmem:[%s2982_s1 + $0x228] sm:$0xff] }
  0x26   :  { %565 = vmatmul.mubr.f32.vlgmr.msra.gmra.mxu1 %v17_v5  ;;  %1358 = vmatpush3.msra.mxu0 %v118_v6  ;;  %v140_v47 = vld [vmem:[%s2982_s1 + $0x328] sm:$0xff]  ;;  %v123_v48 = vld [vmem:[%s2982_s1 + $0x2a0] sm:$0xff]  ;;  %v122_v52 = vld [vmem:[%s2982_s1 + $0x298] sm:$0xff] }
  0x27   :  { %1393 = vmatpush3.msra.mxu1 %v150_v7  ;;  %1359 = vmatprep.subr.mxu0 %v133_v8  ;;  %v155_v49 = vld [vmem:[%s2982_s1 + $0x3a0] sm:$0xff]  ;;  %v154_v53 = vld [vmem:[%s2982_s1 + $0x398] sm:$0xff]  ;;  %v121_v56 = vld [vmem:[%s2982_s1 + $0x290] sm:$0xff] }
  0x28   :  { %1394 = vmatprep.subr.mxu1 %v165_v9  ;;  %1360 = vmatpush3.msra.mxu0 %v117_v10  ;;  %v107_v50 = vld [vmem:[%s2982_s1 + $0x220] sm:$0xff]  ;;  %v106_v54 = vld [vmem:[%s2982_s1 + $0x218] sm:$0xff]  ;;  %v153_v57 = vld [vmem:[%s2982_s1 + $0x390] sm:$0xff] }
  0x29   :  { %1395 = vmatpush3.msra.mxu1 %v149_v11  ;;  %1361 = vmatprep.subr.mxu0 %v132_v12  ;;  %v139_v51 = vld [vmem:[%s2982_s1 + $0x320] sm:$0xff]  ;;  %v138_v55 = vld [vmem:[%s2982_s1 + $0x318] sm:$0xff]  ;;  %v105_v58 = vld [vmem:[%s2982_s1 + $0x210] sm:$0xff] }
  0x2a   :  { %1396 = vmatprep.subr.mxu1 %v164_v13  ;;  %1362 = vmatpush3.msra.mxu0 %v116_v14  ;;  %v137_v59 = vld [vmem:[%s2982_s1 + $0x310] sm:$0xff]  ;;  %v120_v60 = vld [vmem:[%s2982_s1 + $0x288] sm:$0xff]  ;;  %v119_v0 = vld [vmem:[%s2982_s1 + $0x280] sm:$0xff] }
  0x2b   :  { %1397 = vmatpush3.msra.mxu1 %v148_v15  ;;  %1363 = vmatprep.subr.mxu0 %v131_v16  ;;  %v152_v61 = vld [vmem:[%s2982_s1 + $0x388] sm:$0xff]  ;;  %v151_v1 = vld [vmem:[%s2982_s1 + $0x380] sm:$0xff]  ;;  %v22_v6 = vld [vmem:[%s2981_s0 + $0x38] sm:$0xff] }
  0x2c   :  { %1398 = vmatprep.subr.mxu1 %v163_v17  ;;  %1364 = vmatpush3.msra.mxu0 %v115_v18  ;;  %v104_v62 = vld [vmem:[%s2982_s1 + $0x208] sm:$0xff]  ;;  %v103_v2 = vld [vmem:[%s2982_s1 + $0x200] sm:$0xff]  ;;  %v198_v7 = vld [vmem:[%s2982_s1 + $0x4f8] sm:$0xff] }
  0x2d   :  { %1399 = vmatpush3.msra.mxu1 %v147_v19  ;;  %1365 = vmatprep.subr.mxu0 %v130_v20  ;;  %v136_v63 = vld [vmem:[%s2982_s1 + $0x308] sm:$0xff]  ;;  %v135_v4 = vld [vmem:[%s2982_s1 + $0x300] sm:$0xff]  ;;  %v230_v8 = vld [vmem:[%s2982_s1 + $0x5f8] sm:$0xff] }
  0x2e   :  { %1400 = vmatprep.subr.mxu1 %v162_v21  ;;  %1366 = vmatpush3.msra.mxu0 %v114_v22  ;;  %v20_v3 = vld [vmem:[%s2981_s0 + $0x28] sm:$0xff]  ;;  %v19_v5 = vld [vmem:[%s2981_s0 + $0x20] sm:$0xff]  ;;  %v21_v9 = vld [vmem:[%s2981_s0 + $0x30] sm:$0xff] }
  0x2f   :  { %1401 = vmatpush3.msra.mxu1 %v146_v23  ;;  %1367 = vmatprep.subr.mxu0 %v129_v24  ;;  %v182_v10 = vld [vmem:[%s2982_s1 + $0x478] sm:$0xff]  ;;  %v197_v12 = vld [vmem:[%s2982_s1 + $0x4f0] sm:$0xff]  ;;  %v196_v16 = vld [vmem:[%s2982_s1 + $0x4e8] sm:$0xff] }
  0x30   :  { %1402 = vmatprep.subr.mxu1 %v161_v25  ;;  %1368 = vmatpush3.msra.mxu0 %v113_v26  ;;  %v214_v11 = vld [vmem:[%s2982_s1 + $0x578] sm:$0xff]  ;;  %v229_v13 = vld [vmem:[%s2982_s1 + $0x5f0] sm:$0xff]  ;;  %v228_v17 = vld [vmem:[%s2982_s1 + $0x5e8] sm:$0xff] }
  0x31   :  { %1403 = vmatpush3.msra.mxu1 %v145_v27  ;;  %1369 = vmatprep.subr.mxu0 %v128_v28  ;;  %v181_v14 = vld [vmem:[%s2982_s1 + $0x470] sm:$0xff]  ;;  %v180_v18 = vld [vmem:[%s2982_s1 + $0x468] sm:$0xff]  ;;  %v195_v20 = vld [vmem:[%s2982_s1 + $0x4e0] sm:$0xff] }
  0x32   :  { %1404 = vmatprep.subr.mxu1 %v160_v29  ;;  %1370 = vmatpush3.msra.mxu0 %v112_v30  ;;  %v213_v15 = vld [vmem:[%s2982_s1 + $0x570] sm:$0xff]  ;;  %v212_v19 = vld [vmem:[%s2982_s1 + $0x568] sm:$0xff]  ;;  %v227_v21 = vld [vmem:[%s2982_s1 + $0x5e0] sm:$0xff] }
  0x33   :  { %1405 = vmatpush3.msra.mxu1 %v144_v31  ;;  %1371 = vmatprep.subr.mxu0 %v127_v32  ;;  %v179_v22 = vld [vmem:[%s2982_s1 + $0x460] sm:$0xff]  ;;  %v194_v24 = vld [vmem:[%s2982_s1 + $0x4d8] sm:$0xff]  ;;  %v193_v28 = vld [vmem:[%s2982_s1 + $0x4d0] sm:$0xff] }
  0x34   :  { %1406 = vmatprep.subr.mxu1 %v159_v33  ;;  %1372 = vmatpush3.msra.mxu0 %v111_v34  ;;  %v211_v23 = vld [vmem:[%s2982_s1 + $0x560] sm:$0xff]  ;;  %v226_v25 = vld [vmem:[%s2982_s1 + $0x5d8] sm:$0xff]  ;;  %v225_v29 = vld [vmem:[%s2982_s1 + $0x5d0] sm:$0xff] }
  0x35   :  { %1407 = vmatpush3.msra.mxu1 %v143_v35  ;;  %1373 = vmatprep.subr.mxu0 %v126_v36  ;;  %v178_v26 = vld [vmem:[%s2982_s1 + $0x458] sm:$0xff]  ;;  %v177_v30 = vld [vmem:[%s2982_s1 + $0x450] sm:$0xff]  ;;  %v192_v32 = vld [vmem:[%s2982_s1 + $0x4c8] sm:$0xff] }
  0x36   :  { %1408 = vmatprep.subr.mxu1 %v158_v37  ;;  %1374 = vmatpush3.msra.mxu0 %v110_v38  ;;  %v210_v27 = vld [vmem:[%s2982_s1 + $0x558] sm:$0xff]  ;;  %v209_v31 = vld [vmem:[%s2982_s1 + $0x550] sm:$0xff]  ;;  %v224_v33 = vld [vmem:[%s2982_s1 + $0x5c8] sm:$0xff] }
  0x37   :  { %1409 = vmatpush3.msra.mxu1 %v142_v39  ;;  %1375 = vmatprep.subr.mxu0 %v125_v40  ;;  %v176_v34 = vld [vmem:[%s2982_s1 + $0x448] sm:$0xff]  ;;  %v191_v36 = vld [vmem:[%s2982_s1 + $0x4c0] sm:$0xff]  ;;  %v190_v40 = vld [vmem:[%s2982_s1 + $0x4b8] sm:$0xff] }
  0x38   :  { %1410 = vmatprep.subr.mxu1 %v157_v41  ;;  %1376 = vmatpush3.msra.mxu0 %v109_v42  ;;  %v208_v35 = vld [vmem:[%s2982_s1 + $0x548] sm:$0xff]  ;;  %v223_v37 = vld [vmem:[%s2982_s1 + $0x5c0] sm:$0xff]  ;;  %v222_v41 = vld [vmem:[%s2982_s1 + $0x5b8] sm:$0xff] }
  0x39   :  { %1411 = vmatpush3.msra.mxu1 %v141_v43  ;;  %1377 = vmatprep.subr.mxu0 %v124_v44  ;;  %v175_v38 = vld [vmem:[%s2982_s1 + $0x440] sm:$0xff]  ;;  %v174_v42 = vld [vmem:[%s2982_s1 + $0x438] sm:$0xff]  ;;  %v189_v44 = vld [vmem:[%s2982_s1 + $0x4b0] sm:$0xff] }
  0x3a   :  { %1412 = vmatprep.subr.mxu1 %v156_v45  ;;  %1378 = vmatpush3.msra.mxu0 %v108_v46  ;;  %v207_v39 = vld [vmem:[%s2982_s1 + $0x540] sm:$0xff]  ;;  %v206_v43 = vld [vmem:[%s2982_s1 + $0x538] sm:$0xff]  ;;  %v221_v45 = vld [vmem:[%s2982_s1 + $0x5b0] sm:$0xff] }
  0x3b   :  { %1413 = vmatpush3.msra.mxu1 %v140_v47  ;;  %1379 = vmatprep.subr.mxu0 %v123_v48  ;;  %v173_v46 = vld [vmem:[%s2982_s1 + $0x430] sm:$0xff]  ;;  %v188_v48 = vld [vmem:[%s2982_s1 + $0x4a8] sm:$0xff] }
  0x3c   :  { %1414 = vmatprep.subr.mxu1 %v155_v49  ;;  %1380 = vmatpush3.msra.mxu0 %v107_v50  ;;  %v205_v47 = vld [vmem:[%s2982_s1 + $0x530] sm:$0xff]  ;;  %v220_v49 = vld [vmem:[%s2982_s1 + $0x5a8] sm:$0xff] }
  0x3d   :  { %1415 = vmatpush3.msra.mxu1 %v139_v51  ;;  %1381 = vmatprep.subr.mxu0 %v122_v52  ;;  %v172_v50 = vld [vmem:[%s2982_s1 + $0x428] sm:$0xff]  ;;  %v187_v52 = vld [vmem:[%s2982_s1 + $0x4a0] sm:$0xff] }
  0x3e   :  { %1416 = vmatprep.subr.mxu1 %v154_v53  ;;  %1382 = vmatpush3.msra.mxu0 %v106_v54  ;;  %v204_v51 = vld [vmem:[%s2982_s1 + $0x528] sm:$0xff]  ;;  %v219_v53 = vld [vmem:[%s2982_s1 + $0x5a0] sm:$0xff] }
  0x3f   :  { %1417 = vmatpush3.msra.mxu1 %v138_v55  ;;  %1383 = vmatprep.subr.mxu0 %v121_v56  ;;  %v171_v54 = vld [vmem:[%s2982_s1 + $0x420] sm:$0xff]  ;;  %v186_v56 = vld [vmem:[%s2982_s1 + $0x498] sm:$0xff] }
  0x40   :  { %1418 = vmatprep.subr.mxu1 %v153_v57  ;;  %1384 = vmatpush3.msra.mxu0 %v105_v58  ;;  %v203_v55 = vld [vmem:[%s2982_s1 + $0x520] sm:$0xff]  ;;  %v218_v57 = vld [vmem:[%s2982_s1 + $0x598] sm:$0xff] }
  0x41   :  { %1419 = vmatpush3.msra.mxu1 %v137_v59  ;;  %1385 = vmatprep.subr.mxu0 %v120_v60  ;;  %v170_v58 = vld [vmem:[%s2982_s1 + $0x418] sm:$0xff]  ;;  %v185_v60 = vld [vmem:[%s2982_s1 + $0x490] sm:$0xff] }
  0x42   :  { %1420 = vmatprep.subr.mxu1 %v152_v61  ;;  %1386 = vmatpush3.msra.mxu0 %v104_v62  ;;  %v202_v59 = vld [vmem:[%s2982_s1 + $0x518] sm:$0xff]  ;;  %v217_v61 = vld [vmem:[%s2982_s1 + $0x590] sm:$0xff] }
  0x43   :  { %1421 = vmatpush3.msra.mxu1 %v136_v63  ;;  %1387 = vmatprep.subr.mxu0 %v119_v0  ;;  %v169_v62 = vld [vmem:[%s2982_s1 + $0x410] sm:$0xff]  ;;  %v184_v0 = vld [vmem:[%s2982_s1 + $0x488] sm:$0xff] }
  0x44   :  { %1422 = vmatprep.subr.mxu1 %v151_v1  ;;  %1388 = vmatpush3.msra.mxu0 %v103_v2  ;;  %v201_v63 = vld [vmem:[%s2982_s1 + $0x510] sm:$0xff]  ;;  %v216_v1 = vld [vmem:[%s2982_s1 + $0x588] sm:$0xff] }
  0x45   :  { %634 = vmatprep.mubr.f32.mxu0 %v20_v3  ;;  %1423 = vmatpush3.msra.mxu1 %v135_v4  ;;  %v168_v2 = vld [vmem:[%s2982_s1 + $0x408] sm:$0xff]  ;;  %v183_v4 = vld [vmem:[%s2982_s1 + $0x480] sm:$0xff] }
  0x46   :  { %635 = vmatmul.mubr.f32.vlgmr.msra.gmra.mxu0 %v19_v5  ;;  %704 = vmatprep.mubr.f32.mxu1 %v22_v6  ;;  %v200_v3 = vld [vmem:[%s2982_s1 + $0x508] sm:$0xff]  ;;  %v215_v5 = vld [vmem:[%s2982_s1 + $0x580] sm:$0xff] }
  0x47   :  { %1427 = vmatprep.subr.mxu0 %v198_v7  ;;  %1462 = vmatprep.subr.mxu1 %v230_v8  ;;  %v167_v6 = vld [vmem:[%s2982_s1 + $0x400] sm:$0xff]  ;;  %v24_v7 = vld [vmem:[%s2981_s0 + $0x48] sm:$0xff] }
  0x48   :  { %705 = vmatmul.mubr.f32.vlgmr.msra.gmra.mxu1 %v21_v9  ;;  %1428 = vmatpush3.msra.mxu0 %v182_v10  ;;  %v199_v8 = vld [vmem:[%s2982_s1 + $0x500] sm:$0xff]  ;;  %v26_v10 = vld [vmem:[%s2981_s0 + $0x58] sm:$0xff] }
  0x49   :  { %1463 = vmatpush3.msra.mxu1 %v214_v11  ;;  %1429 = vmatprep.subr.mxu0 %v197_v12  ;;  %v23_v9 = vld [vmem:[%s2981_s0 + $0x40] sm:$0xff]  ;;  %v262_v11 = vld [vmem:[%s2982_s1 + $0x6f8] sm:$0xff] }
  0x4a   :  { %1464 = vmatprep.subr.mxu1 %v229_v13  ;;  %1430 = vmatpush3.msra.mxu0 %v181_v14  ;;  %v294_v12 = vld [vmem:[%s2982_s1 + $0x7f8] sm:$0xff]  ;;  %v25_v13 = vld [vmem:[%s2981_s0 + $0x50] sm:$0xff] }
  0x4b   :  { %1465 = vmatpush3.msra.mxu1 %v213_v15  ;;  %1431 = vmatprep.subr.mxu0 %v196_v16  ;;  %v246_v14 = vld [vmem:[%s2982_s1 + $0x678] sm:$0xff]  ;;  %v261_v16 = vld [vmem:[%s2982_s1 + $0x6f0] sm:$0xff] }
  0x4c   :  { %1466 = vmatprep.subr.mxu1 %v228_v17  ;;  %1432 = vmatpush3.msra.mxu0 %v180_v18  ;;  %v278_v15 = vld [vmem:[%s2982_s1 + $0x778] sm:$0xff]  ;;  %v293_v17 = vld [vmem:[%s2982_s1 + $0x7f0] sm:$0xff] }
  0x4d   :  { %1467 = vmatpush3.msra.mxu1 %v212_v19  ;;  %1433 = vmatprep.subr.mxu0 %v195_v20  ;;  %v245_v18 = vld [vmem:[%s2982_s1 + $0x670] sm:$0xff]  ;;  %v260_v20 = vld [vmem:[%s2982_s1 + $0x6e8] sm:$0xff] }
  0x4e   :  { %1468 = vmatprep.subr.mxu1 %v227_v21  ;;  %1434 = vmatpush3.msra.mxu0 %v179_v22  ;;  %v277_v19 = vld [vmem:[%s2982_s1 + $0x770] sm:$0xff]  ;;  %v292_v21 = vld [vmem:[%s2982_s1 + $0x7e8] sm:$0xff] }
  0x4f   :  { %1469 = vmatpush3.msra.mxu1 %v211_v23  ;;  %1435 = vmatprep.subr.mxu0 %v194_v24  ;;  %v244_v22 = vld [vmem:[%s2982_s1 + $0x668] sm:$0xff]  ;;  %v259_v24 = vld [vmem:[%s2982_s1 + $0x6e0] sm:$0xff] }
  0x50   :  { %1470 = vmatprep.subr.mxu1 %v226_v25  ;;  %1436 = vmatpush3.msra.mxu0 %v178_v26  ;;  %v276_v23 = vld [vmem:[%s2982_s1 + $0x768] sm:$0xff]  ;;  %v291_v25 = vld [vmem:[%s2982_s1 + $0x7e0] sm:$0xff] }
  0x51   :  { %1471 = vmatpush3.msra.mxu1 %v210_v27  ;;  %1437 = vmatprep.subr.mxu0 %v193_v28  ;;  %v243_v26 = vld [vmem:[%s2982_s1 + $0x660] sm:$0xff]  ;;  %v258_v28 = vld [vmem:[%s2982_s1 + $0x6d8] sm:$0xff] }
  0x52   :  { %1472 = vmatprep.subr.mxu1 %v225_v29  ;;  %1438 = vmatpush3.msra.mxu0 %v177_v30  ;;  %v275_v27 = vld [vmem:[%s2982_s1 + $0x760] sm:$0xff]  ;;  %v290_v29 = vld [vmem:[%s2982_s1 + $0x7d8] sm:$0xff] }
  0x53   :  { %1473 = vmatpush3.msra.mxu1 %v209_v31  ;;  %1439 = vmatprep.subr.mxu0 %v192_v32  ;;  %v242_v30 = vld [vmem:[%s2982_s1 + $0x658] sm:$0xff]  ;;  %v257_v32 = vld [vmem:[%s2982_s1 + $0x6d0] sm:$0xff] }
  0x54   :  { %1474 = vmatprep.subr.mxu1 %v224_v33  ;;  %1440 = vmatpush3.msra.mxu0 %v176_v34  ;;  %v274_v31 = vld [vmem:[%s2982_s1 + $0x758] sm:$0xff]  ;;  %v289_v33 = vld [vmem:[%s2982_s1 + $0x7d0] sm:$0xff] }
  0x55   :  { %1475 = vmatpush3.msra.mxu1 %v208_v35  ;;  %1441 = vmatprep.subr.mxu0 %v191_v36  ;;  %v241_v34 = vld [vmem:[%s2982_s1 + $0x650] sm:$0xff]  ;;  %v256_v36 = vld [vmem:[%s2982_s1 + $0x6c8] sm:$0xff] }
  0x56   :  { %1476 = vmatprep.subr.mxu1 %v223_v37  ;;  %1442 = vmatpush3.msra.mxu0 %v175_v38  ;;  %v273_v35 = vld [vmem:[%s2982_s1 + $0x750] sm:$0xff]  ;;  %v288_v37 = vld [vmem:[%s2982_s1 + $0x7c8] sm:$0xff] }
  0x57   :  { %1477 = vmatpush3.msra.mxu1 %v207_v39  ;;  %1443 = vmatprep.subr.mxu0 %v190_v40  ;;  %v240_v38 = vld [vmem:[%s2982_s1 + $0x648] sm:$0xff]  ;;  %v255_v40 = vld [vmem:[%s2982_s1 + $0x6c0] sm:$0xff] }
  0x58   :  { %1478 = vmatprep.subr.mxu1 %v222_v41  ;;  %1444 = vmatpush3.msra.mxu0 %v174_v42  ;;  %v272_v39 = vld [vmem:[%s2982_s1 + $0x748] sm:$0xff]  ;;  %v287_v41 = vld [vmem:[%s2982_s1 + $0x7c0] sm:$0xff] }
  0x59   :  { %1479 = vmatpush3.msra.mxu1 %v206_v43  ;;  %1445 = vmatprep.subr.mxu0 %v189_v44  ;;  %v239_v42 = vld [vmem:[%s2982_s1 + $0x640] sm:$0xff]  ;;  %v254_v44 = vld [vmem:[%s2982_s1 + $0x6b8] sm:$0xff] }
  0x5a   :  { %1480 = vmatprep.subr.mxu1 %v221_v45  ;;  %1446 = vmatpush3.msra.mxu0 %v173_v46  ;;  %v271_v43 = vld [vmem:[%s2982_s1 + $0x740] sm:$0xff]  ;;  %v286_v45 = vld [vmem:[%s2982_s1 + $0x7b8] sm:$0xff] }
  0x5b   :  { %1481 = vmatpush3.msra.mxu1 %v205_v47  ;;  %1447 = vmatprep.subr.mxu0 %v188_v48  ;;  %v238_v46 = vld [vmem:[%s2982_s1 + $0x638] sm:$0xff]  ;;  %v253_v48 = vld [vmem:[%s2982_s1 + $0x6b0] sm:$0xff] }
  0x5c   :  { %1482 = vmatprep.subr.mxu1 %v220_v49  ;;  %1448 = vmatpush3.msra.mxu0 %v172_v50  ;;  %v270_v47 = vld [vmem:[%s2982_s1 + $0x738] sm:$0xff]  ;;  %v285_v49 = vld [vmem:[%s2982_s1 + $0x7b0] sm:$0xff] }
  0x5d   :  { %1483 = vmatpush3.msra.mxu1 %v204_v51  ;;  %1449 = vmatprep.subr.mxu0 %v187_v52  ;;  %v237_v50 = vld [vmem:[%s2982_s1 + $0x630] sm:$0xff]  ;;  %v252_v52 = vld [vmem:[%s2982_s1 + $0x6a8] sm:$0xff] }
  0x5e   :  { %1484 = vmatprep.subr.mxu1 %v219_v53  ;;  %1450 = vmatpush3.msra.mxu0 %v171_v54  ;;  %v269_v51 = vld [vmem:[%s2982_s1 + $0x730] sm:$0xff]  ;;  %v284_v53 = vld [vmem:[%s2982_s1 + $0x7a8] sm:$0xff] }
  0x5f   :  { %1485 = vmatpush3.msra.mxu1 %v203_v55  ;;  %1451 = vmatprep.subr.mxu0 %v186_v56  ;;  %v236_v54 = vld [vmem:[%s2982_s1 + $0x628] sm:$0xff]  ;;  %v251_v56 = vld [vmem:[%s2982_s1 + $0x6a0] sm:$0xff] }
  0x60   :  { %1486 = vmatprep.subr.mxu1 %v218_v57  ;;  %1452 = vmatpush3.msra.mxu0 %v170_v58  ;;  %v268_v55 = vld [vmem:[%s2982_s1 + $0x728] sm:$0xff]  ;;  %v283_v57 = vld [vmem:[%s2982_s1 + $0x7a0] sm:$0xff] }
  0x61   :  { %1487 = vmatpush3.msra.mxu1 %v202_v59  ;;  %1453 = vmatprep.subr.mxu0 %v185_v60  ;;  %v235_v58 = vld [vmem:[%s2982_s1 + $0x620] sm:$0xff]  ;;  %v250_v60 = vld [vmem:[%s2982_s1 + $0x698] sm:$0xff] }
  0x62   :  { %1488 = vmatprep.subr.mxu1 %v217_v61  ;;  %1454 = vmatpush3.msra.mxu0 %v169_v62  ;;  %v267_v59 = vld [vmem:[%s2982_s1 + $0x720] sm:$0xff]  ;;  %v282_v61 = vld [vmem:[%s2982_s1 + $0x798] sm:$0xff] }
  0x63   :  { %1489 = vmatpush3.msra.mxu1 %v201_v63  ;;  %1455 = vmatprep.subr.mxu0 %v184_v0  ;;  %v234_v62 = vld [vmem:[%s2982_s1 + $0x618] sm:$0xff]  ;;  %v249_v0 = vld [vmem:[%s2982_s1 + $0x690] sm:$0xff] }
  0x64   :  { %1490 = vmatprep.subr.mxu1 %v216_v1  ;;  %1456 = vmatpush3.msra.mxu0 %v168_v2  ;;  %v266_v63 = vld [vmem:[%s2982_s1 + $0x718] sm:$0xff]  ;;  %v281_v1 = vld [vmem:[%s2982_s1 + $0x790] sm:$0xff] }
  0x65   :  { %1491 = vmatpush3.msra.mxu1 %v200_v3  ;;  %1457 = vmatprep.subr.mxu0 %v183_v4  ;;  %v233_v2 = vld [vmem:[%s2982_s1 + $0x610] sm:$0xff]  ;;  %v248_v4 = vld [vmem:[%s2982_s1 + $0x688] sm:$0xff] }
  0x66   :  { %1492 = vmatprep.subr.mxu1 %v215_v5  ;;  %1458 = vmatpush3.msra.mxu0 %v167_v6  ;;  %v265_v3 = vld [vmem:[%s2982_s1 + $0x710] sm:$0xff]  ;;  %v280_v5 = vld [vmem:[%s2982_s1 + $0x788] sm:$0xff] }
  0x67   :  { %774 = vmatprep.mubr.f32.mxu0 %v24_v7  ;;  %1493 = vmatpush3.msra.mxu1 %v199_v8  ;;  %v232_v6 = vld [vmem:[%s2982_s1 + $0x608] sm:$0xff]  ;;  %v247_v8 = vld [vmem:[%s2982_s1 + $0x680] sm:$0xff] }
  0x68   :  { %775 = vmatmul.mubr.f32.vlgmr.msra.gmra.mxu0 %v23_v9  ;;  %844 = vmatprep.mubr.f32.mxu1 %v26_v10  ;;  %v264_v7 = vld [vmem:[%s2982_s1 + $0x708] sm:$0xff]  ;;  %v279_v9 = vld [vmem:[%s2982_s1 + $0x780] sm:$0xff] }
  0x69   :  { %1497 = vmatprep.subr.mxu0 %v262_v11  ;;  %1532 = vmatprep.subr.mxu1 %v294_v12  ;;  %v231_v10 = vld [vmem:[%s2982_s1 + $0x600] sm:$0xff]  ;;  %v28_v11 = vld [vmem:[%s2981_s0 + $0x68] sm:$0xff] }
  0x6a   :  { %845 = vmatmul.mubr.f32.vlgmr.msra.gmra.mxu1 %v25_v13  ;;  %1498 = vmatpush3.msra.mxu0 %v246_v14  ;;  %v263_v12 = vld [vmem:[%s2982_s1 + $0x700] sm:$0xff]  ;;  %v30_v14 = vld [vmem:[%s2981_s0 + $0x78] sm:$0xff] }
  0x6b   :  { %1533 = vmatpush3.msra.mxu1 %v278_v15  ;;  %1499 = vmatprep.subr.mxu0 %v261_v16  ;;  %v27_v13 = vld [vmem:[%s2981_s0 + $0x60] sm:$0xff]  ;;  %v326_v15 = vld [vmem:[%s2982_s1 + $0x8f8] sm:$0xff] }
  0x6c   :  { %1534 = vmatprep.subr.mxu1 %v293_v17  ;;  %1500 = vmatpush3.msra.mxu0 %v245_v18  ;;  %v358_v16 = vld [vmem:[%s2982_s1 + $0x9f8] sm:$0xff]  ;;  %v29_v17 = vld [vmem:[%s2981_s0 + $0x70] sm:$0xff] }
  0x6d   :  { %1535 = vmatpush3.msra.mxu1 %v277_v19  ;;  %1501 = vmatprep.subr.mxu0 %v260_v20  ;;  %v310_v18 = vld [vmem:[%s2982_s1 + $0x878] sm:$0xff]  ;;  %v325_v20 = vld [vmem:[%s2982_s1 + $0x8f0] sm:$0xff] }
  0x6e   :  { %1536 = vmatprep.subr.mxu1 %v292_v21  ;;  %1502 = vmatpush3.msra.mxu0 %v244_v22  ;;  %v342_v19 = vld [vmem:[%s2982_s1 + $0x978] sm:$0xff]  ;;  %v357_v21 = vld [vmem:[%s2982_s1 + $0x9f0] sm:$0xff] }
  0x6f   :  { %1537 = vmatpush3.msra.mxu1 %v276_v23  ;;  %1503 = vmatprep.subr.mxu0 %v259_v24 }
  0x70   :  { %1538 = vmatprep.subr.mxu1 %v291_v25  ;;  %1504 = vmatpush3.msra.mxu0 %v243_v26 }
  0x71   :  { %1539 = vmatpush3.msra.mxu1 %v275_v27  ;;  %1505 = vmatprep.subr.mxu0 %v258_v28 }
  0x72   :  { %1540 = vmatprep.subr.mxu1 %v290_v29  ;;  %1506 = vmatpush3.msra.mxu0 %v242_v30 }
  0x73   :  { %1541 = vmatpush3.msra.mxu1 %v274_v31  ;;  %1507 = vmatprep.subr.mxu0 %v257_v32 }
  0x74   :  { %1542 = vmatprep.subr.mxu1 %v289_v33  ;;  %1508 = vmatpush3.msra.mxu0 %v241_v34 }
  0x75   :  { %1543 = vmatpush3.msra.mxu1 %v273_v35  ;;  %1509 = vmatprep.subr.mxu0 %v256_v36 }
  0x76   :  { %1544 = vmatprep.subr.mxu1 %v288_v37  ;;  %1510 = vmatpush3.msra.mxu0 %v240_v38 }
  0x77   :  { %1545 = vmatpush3.msra.mxu1 %v272_v39  ;;  %1511 = vmatprep.subr.mxu0 %v255_v40 }
  0x78   :  { %1546 = vmatprep.subr.mxu1 %v287_v41  ;;  %1512 = vmatpush3.msra.mxu0 %v239_v42 }
  0x79   :  { %1547 = vmatpush3.msra.mxu1 %v271_v43  ;;  %1513 = vmatprep.subr.mxu0 %v254_v44 }
  0x7a   :  { %1548 = vmatprep.subr.mxu1 %v286_v45  ;;  %1514 = vmatpush3.msra.mxu0 %v238_v46 }
  0x7b   :  { %1549 = vmatpush3.msra.mxu1 %v270_v47  ;;  %1515 = vmatprep.subr.mxu0 %v253_v48 }
  0x7c   :  { %1550 = vmatprep.subr.mxu1 %v285_v49  ;;  %1516 = vmatpush3.msra.mxu0 %v237_v50 }
  0x7d   :  { %1551 = vmatpush3.msra.mxu1 %v269_v51  ;;  %1517 = vmatprep.subr.mxu0 %v252_v52 }
  0x7e   :  { %1552 = vmatprep.subr.mxu1 %v284_v53  ;;  %1518 = vmatpush3.msra.mxu0 %v236_v54 }
  0x7f   :  { %1553 = vmatpush3.msra.mxu1 %v268_v55  ;;  %1519 = vmatprep.subr.mxu0 %v251_v56 }
  0x80   :  { %1554 = vmatprep.subr.mxu1 %v283_v57  ;;  %1520 = vmatpush3.msra.mxu0 %v235_v58 }
  0x81   :  { %1555 = vmatpush3.msra.mxu1 %v267_v59  ;;  %1521 = vmatprep.subr.mxu0 %v250_v60 }
  0x82   :  { %1556 = vmatprep.subr.mxu1 %v282_v61  ;;  %1522 = vmatpush3.msra.mxu0 %v234_v62 }
  0x83   :  { %1557 = vmatpush3.msra.mxu1 %v266_v63  ;;  %1523 = vmatprep.subr.mxu0 %v249_v0 }
  0x84   :  { %1558 = vmatprep.subr.mxu1 %v281_v1  ;;  %1524 = vmatpush3.msra.mxu0 %v233_v2 }
  0x85   :  { %1559 = vmatpush3.msra.mxu1 %v265_v3  ;;  %1525 = vmatprep.subr.mxu0 %v248_v4 }
  0x86   :  { %1560 = vmatprep.subr.mxu1 %v280_v5  ;;  %1526 = vmatpush3.msra.mxu0 %v232_v6 }
  0x87   :  { %1561 = vmatpush3.msra.mxu1 %v264_v7  ;;  %1527 = vmatprep.subr.mxu0 %v247_v8 }
  0x88   :  { %1562 = vmatprep.subr.mxu1 %v279_v9  ;;  %1528 = vmatpush3.msra.mxu0 %v231_v10 }
  0x89   :  { %914 = vmatprep.mubr.f32.mxu0 %v28_v11  ;;  %1563 = vmatpush3.msra.mxu1 %v263_v12 }
  0x8a   :  { %915 = vmatmul.mubr.f32.vlgmr.msra.gmra.mxu0 %v27_v13  ;;  %984 = vmatprep.mubr.f32.mxu1 %v30_v14 }
  0x8b   :  { %1567 = vmatprep.subr.mxu0 %v326_v15 }
  0x8c   :  { %8 = vsyncpa [#allocation3], 0  ;;  %1602 = vmatprep.subr.mxu1 %v358_v16  ;;  %985 = vmatmul.mubr.f32.vlgmr.msra.gmra.mxu1 %v29_v17  ;;  %v309_v22 = vld [vmem:[%s2982_s1 + $0x870] sm:$0xff]  ;;  %v324_v24 = vld [vmem:[%s2982_s1 + $0x8e8] sm:$0xff]  ;;  %vm1270_vm0 = vcmask 80896  }
  0x8d   :  { %v341_v23 = vld [vmem:[%s2982_s1 + $0x970] sm:$0xff]  ;;  %1568 = vmatpush3.msra.mxu0 %v310_v18  ;;  %1603 = vmatpush3.msra.mxu1 %v342_v19  ;;  %v356_v25 = vld [vmem:[%s2982_s1 + $0x9e8] sm:$0xff]  ;;  %v323_v28 = vld [vmem:[%s2982_s1 + $0x8e0] sm:$0xff] }
  0x8e   :  { %1569 = vmatprep.subr.mxu0 %v325_v20  ;;  %1604 = vmatprep.subr.mxu1 %v357_v21  ;;  %v308_v26 = vld [vmem:[%s2982_s1 + $0x868] sm:$0xff]  ;;  %v355_v29 = vld [vmem:[%s2982_s1 + $0x9e0] sm:$0xff]  ;;  %v322_v32 = vld [vmem:[%s2982_s1 + $0x8d8] sm:$0xff] }
  0x8f   :  { %v340_v27 = vld [vmem:[%s2982_s1 + $0x968] sm:$0xff]  ;;  %1570 = vmatpush3.msra.mxu0 %v309_v22  ;;  %1605 = vmatpush3.msra.mxu1 %v341_v23  ;;  %v307_v30 = vld [vmem:[%s2982_s1 + $0x860] sm:$0xff]  ;;  %v354_v33 = vld [vmem:[%s2982_s1 + $0x9d8] sm:$0xff] }
  0x90   :  { %1571 = vmatprep.subr.mxu0 %v324_v24  ;;  %1606 = vmatprep.subr.mxu1 %v356_v25  ;;  %v339_v31 = vld [vmem:[%s2982_s1 + $0x960] sm:$0xff]  ;;  %v306_v34 = vld [vmem:[%s2982_s1 + $0x858] sm:$0xff]  ;;  %v321_v36 = vld [vmem:[%s2982_s1 + $0x8d0] sm:$0xff] }
  0x91   :  { %1572 = vmatpush3.msra.mxu0 %v308_v26  ;;  %1607 = vmatpush3.msra.mxu1 %v340_v27  ;;  %v338_v35 = vld [vmem:[%s2982_s1 + $0x958] sm:$0xff]  ;;  %v353_v37 = vld [vmem:[%s2982_s1 + $0x9d0] sm:$0xff]  ;;  %v320_v40 = vld [vmem:[%s2982_s1 + $0x8c8] sm:$0xff] }
  0x92   :  { %1573 = vmatprep.subr.mxu0 %v323_v28  ;;  %1608 = vmatprep.subr.mxu1 %v355_v29  ;;  %v305_v38 = vld [vmem:[%s2982_s1 + $0x850] sm:$0xff]  ;;  %v352_v41 = vld [vmem:[%s2982_s1 + $0x9c8] sm:$0xff]  ;;  %v319_v44 = vld [vmem:[%s2982_s1 + $0x8c0] sm:$0xff] }
  0x93   :  { %1574 = vmatpush3.msra.mxu0 %v307_v30  ;;  %1609 = vmatpush3.msra.mxu1 %v339_v31  ;;  %v337_v39 = vld [vmem:[%s2982_s1 + $0x950] sm:$0xff]  ;;  %v304_v42 = vld [vmem:[%s2982_s1 + $0x848] sm:$0xff]  ;;  %v351_v45 = vld [vmem:[%s2982_s1 + $0x9c0] sm:$0xff] }
  0x94   :  { %1575 = vmatprep.subr.mxu0 %v322_v32  ;;  %1610 = vmatprep.subr.mxu1 %v354_v33  ;;  %v336_v43 = vld [vmem:[%s2982_s1 + $0x948] sm:$0xff]  ;;  %v303_v46 = vld [vmem:[%s2982_s1 + $0x840] sm:$0xff]  ;;  %v318_v48 = vld [vmem:[%s2982_s1 + $0x8b8] sm:$0xff] }
  0x95   :  { %1576 = vmatpush3.msra.mxu0 %v306_v34  ;;  %1611 = vmatpush3.msra.mxu1 %v338_v35  ;;  %v335_v47 = vld [vmem:[%s2982_s1 + $0x940] sm:$0xff]  ;;  %v350_v49 = vld [vmem:[%s2982_s1 + $0x9b8] sm:$0xff]  ;;  %v317_v52 = vld [vmem:[%s2982_s1 + $0x8b0] sm:$0xff] }
  0x96   :  { %1577 = vmatprep.subr.mxu0 %v321_v36  ;;  %1612 = vmatprep.subr.mxu1 %v353_v37  ;;  %v302_v50 = vld [vmem:[%s2982_s1 + $0x838] sm:$0xff]  ;;  %v349_v53 = vld [vmem:[%s2982_s1 + $0x9b0] sm:$0xff]  ;;  %v316_v56 = vld [vmem:[%s2982_s1 + $0x8a8] sm:$0xff] }
  0x97   :  { %1578 = vmatpush3.msra.mxu0 %v305_v38  ;;  %1613 = vmatpush3.msra.mxu1 %v337_v39  ;;  %v334_v51 = vld [vmem:[%s2982_s1 + $0x938] sm:$0xff]  ;;  %v301_v54 = vld [vmem:[%s2982_s1 + $0x830] sm:$0xff]  ;;  %v348_v57 = vld [vmem:[%s2982_s1 + $0x9a8] sm:$0xff] }
  0x98   :  { %1579 = vmatprep.subr.mxu0 %v320_v40  ;;  %1614 = vmatprep.subr.mxu1 %v352_v41  ;;  %v333_v55 = vld [vmem:[%s2982_s1 + $0x930] sm:$0xff]  ;;  %v300_v58 = vld [vmem:[%s2982_s1 + $0x828] sm:$0xff]  ;;  %v315_v60 = vld [vmem:[%s2982_s1 + $0x8a0] sm:$0xff] }
  0x99   :  { %1580 = vmatpush3.msra.mxu0 %v304_v42  ;;  %1615 = vmatpush3.msra.mxu1 %v336_v43  ;;  %v332_v59 = vld [vmem:[%s2982_s1 + $0x928] sm:$0xff]  ;;  %v347_v61 = vld [vmem:[%s2982_s1 + $0x9a0] sm:$0xff]  ;;  %v314_v0 = vld [vmem:[%s2982_s1 + $0x898] sm:$0xff] }
  0x9a   :  { %1581 = vmatprep.subr.mxu0 %v319_v44  ;;  %1616 = vmatprep.subr.mxu1 %v351_v45  ;;  %v299_v62 = vld [vmem:[%s2982_s1 + $0x820] sm:$0xff]  ;;  %v346_v1 = vld [vmem:[%s2982_s1 + $0x998] sm:$0xff]  ;;  %v313_v4 = vld [vmem:[%s2982_s1 + $0x890] sm:$0xff] }
  0x9b   :  { %1582 = vmatpush3.msra.mxu0 %v303_v46  ;;  %1617 = vmatpush3.msra.mxu1 %v335_v47  ;;  %v331_v63 = vld [vmem:[%s2982_s1 + $0x920] sm:$0xff]  ;;  %v298_v2 = vld [vmem:[%s2982_s1 + $0x818] sm:$0xff]  ;;  %v345_v5 = vld [vmem:[%s2982_s1 + $0x990] sm:$0xff] }
  0x9c   :  { %1583 = vmatprep.subr.mxu0 %v318_v48  ;;  %1618 = vmatprep.subr.mxu1 %v350_v49  ;;  %v330_v3 = vld [vmem:[%s2982_s1 + $0x918] sm:$0xff]  ;;  %v297_v6 = vld [vmem:[%s2982_s1 + $0x810] sm:$0xff]  ;;  %v312_v8 = vld [vmem:[%s2982_s1 + $0x888] sm:$0xff] }
  0x9d   :  { %1584 = vmatpush3.msra.mxu0 %v302_v50  ;;  %1619 = vmatpush3.msra.mxu1 %v334_v51  ;;  %v329_v7 = vld [vmem:[%s2982_s1 + $0x910] sm:$0xff]  ;;  %v344_v9 = vld [vmem:[%s2982_s1 + $0x988] sm:$0xff]  ;;  %v311_v12 = vld [vmem:[%s2982_s1 + $0x880] sm:$0xff] }
  0x9e   :  { %1585 = vmatprep.subr.mxu0 %v317_v52  ;;  %1620 = vmatprep.subr.mxu1 %v349_v53  ;;  %v296_v10 = vld [vmem:[%s2982_s1 + $0x808] sm:$0xff]  ;;  %v343_v13 = vld [vmem:[%s2982_s1 + $0x980] sm:$0xff]  ;;  %v34_v18 = vld [vmem:[%s2981_s0 + $0x98] sm:$0xff] }
  0x9f   :  { %1586 = vmatpush3.msra.mxu0 %v301_v54  ;;  %1621 = vmatpush3.msra.mxu1 %v333_v55  ;;  %v328_v11 = vld [vmem:[%s2982_s1 + $0x908] sm:$0xff]  ;;  %v295_v14 = vld [vmem:[%s2982_s1 + $0x800] sm:$0xff]  ;;  %v390_v19 = vld [vmem:[%s2982_s1 + $0xaf8] sm:$0xff] }
  0xa0   :  { %1587 = vmatprep.subr.mxu0 %v316_v56  ;;  %1622 = vmatprep.subr.mxu1 %v348_v57  ;;  %v32_v15 = vld [vmem:[%s2981_s0 + $0x88] sm:$0xff]  ;;  %v327_v16 = vld [vmem:[%s2982_s1 + $0x900] sm:$0xff]  ;;  %v422_v20 = vld [vmem:[%s2982_s1 + $0xbf8] sm:$0xff] }
  0xa1   :  { %1588 = vmatpush3.msra.mxu0 %v300_v58  ;;  %1623 = vmatpush3.msra.mxu1 %v332_v59  ;;  %v31_v17 = vld [vmem:[%s2981_s0 + $0x80] sm:$0xff]  ;;  %v33_v21 = vld [vmem:[%s2981_s0 + $0x90] sm:$0xff]  ;;  %v374_v22 = vld [vmem:[%s2982_s1 + $0xa78] sm:$0xff] }
  0xa2   :  { %1589 = vmatprep.subr.mxu0 %v315_v60  ;;  %1624 = vmatprep.subr.mxu1 %v347_v61  ;;  %v406_v23 = vld [vmem:[%s2982_s1 + $0xb78] sm:$0xff]  ;;  %v389_v24 = vld [vmem:[%s2982_s1 + $0xaf0] sm:$0xff]  ;;  %v388_v28 = vld [vmem:[%s2982_s1 + $0xae8] sm:$0xff] }
  0xa3   :  { %1590 = vmatpush3.msra.mxu0 %v299_v62  ;;  %1625 = vmatpush3.msra.mxu1 %v331_v63  ;;  %v421_v25 = vld [vmem:[%s2982_s1 + $0xbf0] sm:$0xff]  ;;  %v420_v29 = vld [vmem:[%s2982_s1 + $0xbe8] sm:$0xff]  ;;  %v387_v32 = vld [vmem:[%s2982_s1 + $0xae0] sm:$0xff] }
  0xa4   :  { %1591 = vmatprep.subr.mxu0 %v314_v0  ;;  %1626 = vmatprep.subr.mxu1 %v346_v1  ;;  %v373_v26 = vld [vmem:[%s2982_s1 + $0xa70] sm:$0xff]  ;;  %v372_v30 = vld [vmem:[%s2982_s1 + $0xa68] sm:$0xff]  ;;  %v419_v33 = vld [vmem:[%s2982_s1 + $0xbe0] sm:$0xff] }
  0xa5   :  { %1592 = vmatpush3.msra.mxu0 %v298_v2  ;;  %1627 = vmatpush3.msra.mxu1 %v330_v3  ;;  %v405_v27 = vld [vmem:[%s2982_s1 + $0xb70] sm:$0xff]  ;;  %v404_v31 = vld [vmem:[%s2982_s1 + $0xb68] sm:$0xff]  ;;  %v371_v34 = vld [vmem:[%s2982_s1 + $0xa60] sm:$0xff] }
  0xa6   :  { %1593 = vmatprep.subr.mxu0 %v313_v4  ;;  %1628 = vmatprep.subr.mxu1 %v345_v5  ;;  %v403_v35 = vld [vmem:[%s2982_s1 + $0xb60] sm:$0xff]  ;;  %v386_v36 = vld [vmem:[%s2982_s1 + $0xad8] sm:$0xff]  ;;  %v385_v40 = vld [vmem:[%s2982_s1 + $0xad0] sm:$0xff] }
  0xa7   :  { %1594 = vmatpush3.msra.mxu0 %v297_v6  ;;  %1629 = vmatpush3.msra.mxu1 %v329_v7  ;;  %v418_v37 = vld [vmem:[%s2982_s1 + $0xbd8] sm:$0xff]  ;;  %v417_v41 = vld [vmem:[%s2982_s1 + $0xbd0] sm:$0xff]  ;;  %v384_v44 = vld [vmem:[%s2982_s1 + $0xac8] sm:$0xff] }
  0xa8   :  { %1595 = vmatprep.subr.mxu0 %v312_v8  ;;  %1630 = vmatprep.subr.mxu1 %v344_v9  ;;  %v370_v38 = vld [vmem:[%s2982_s1 + $0xa58] sm:$0xff]  ;;  %v369_v42 = vld [vmem:[%s2982_s1 + $0xa50] sm:$0xff]  ;;  %v416_v45 = vld [vmem:[%s2982_s1 + $0xbc8] sm:$0xff] }
  0xa9   :  { %1596 = vmatpush3.msra.mxu0 %v296_v10  ;;  %1631 = vmatpush3.msra.mxu1 %v328_v11  ;;  %v402_v39 = vld [vmem:[%s2982_s1 + $0xb58] sm:$0xff]  ;;  %v401_v43 = vld [vmem:[%s2982_s1 + $0xb50] sm:$0xff]  ;;  %v368_v46 = vld [vmem:[%s2982_s1 + $0xa48] sm:$0xff] }
  0xaa   :  { %1597 = vmatprep.subr.mxu0 %v311_v12  ;;  %1632 = vmatprep.subr.mxu1 %v343_v13  ;;  %v400_v47 = vld [vmem:[%s2982_s1 + $0xb48] sm:$0xff]  ;;  %v383_v48 = vld [vmem:[%s2982_s1 + $0xac0] sm:$0xff]  ;;  %v382_v52 = vld [vmem:[%s2982_s1 + $0xab8] sm:$0xff] }
  0xab   :  { %1598 = vmatpush3.msra.mxu0 %v295_v14  ;;  %1054 = vmatprep.mubr.f32.mxu0 %v32_v15  ;;  %v415_v49 = vld [vmem:[%s2982_s1 + $0xbc0] sm:$0xff]  ;;  %v414_v53 = vld [vmem:[%s2982_s1 + $0xbb8] sm:$0xff]  ;;  %v381_v56 = vld [vmem:[%s2982_s1 + $0xab0] sm:$0xff] }
  0xac   :  { %1633 = vmatpush3.msra.mxu1 %v327_v16  ;;  %1055 = vmatmul.mubr.f32.vlgmr.msra.gmra.mxu0 %v31_v17  ;;  %v367_v50 = vld [vmem:[%s2982_s1 + $0xa40] sm:$0xff]  ;;  %v366_v54 = vld [vmem:[%s2982_s1 + $0xa38] sm:$0xff]  ;;  %v413_v57 = vld [vmem:[%s2982_s1 + $0xbb0] sm:$0xff] }
  0xad   :  { %1124 = vmatprep.mubr.f32.mxu1 %v34_v18  ;;  %1637 = vmatprep.subr.mxu0 %v390_v19  ;;  %v399_v51 = vld [vmem:[%s2982_s1 + $0xb40] sm:$0xff]  ;;  %v398_v55 = vld [vmem:[%s2982_s1 + $0xb38] sm:$0xff]  ;;  %v365_v58 = vld [vmem:[%s2982_s1 + $0xa30] sm:$0xff] }
  0xae   :  { %1672 = vmatprep.subr.mxu1 %v422_v20  ;;  %1125 = vmatmul.mubr.f32.vlgmr.msra.gmra.mxu1 %v33_v21  ;;  %v397_v59 = vld [vmem:[%s2982_s1 + $0xb30] sm:$0xff]  ;;  %v380_v60 = vld [vmem:[%s2982_s1 + $0xaa8] sm:$0xff]  ;;  %v379_v0 = vld [vmem:[%s2982_s1 + $0xaa0] sm:$0xff] }
  0xaf   :  { %1638 = vmatpush3.msra.mxu0 %v374_v22  ;;  %1673 = vmatpush3.msra.mxu1 %v406_v23  ;;  %v412_v61 = vld [vmem:[%s2982_s1 + $0xba8] sm:$0xff]  ;;  %v411_v1 = vld [vmem:[%s2982_s1 + $0xba0] sm:$0xff]  ;;  %v378_v4 = vld [vmem:[%s2982_s1 + $0xa98] sm:$0xff] }
  0xb0   :  { %1639 = vmatprep.subr.mxu0 %v389_v24  ;;  %1674 = vmatprep.subr.mxu1 %v421_v25  ;;  %v364_v62 = vld [vmem:[%s2982_s1 + $0xa28] sm:$0xff]  ;;  %v363_v2 = vld [vmem:[%s2982_s1 + $0xa20] sm:$0xff]  ;;  %v410_v5 = vld [vmem:[%s2982_s1 + $0xb98] sm:$0xff] }
  0xb1   :  { %1640 = vmatpush3.msra.mxu0 %v373_v26  ;;  %1675 = vmatpush3.msra.mxu1 %v405_v27  ;;  %v396_v63 = vld [vmem:[%s2982_s1 + $0xb28] sm:$0xff]  ;;  %v395_v3 = vld [vmem:[%s2982_s1 + $0xb20] sm:$0xff]  ;;  %v362_v6 = vld [vmem:[%s2982_s1 + $0xa18] sm:$0xff] }
  0xb2   :  { %1641 = vmatprep.subr.mxu0 %v388_v28  ;;  %1676 = vmatprep.subr.mxu1 %v420_v29  ;;  %v394_v7 = vld [vmem:[%s2982_s1 + $0xb18] sm:$0xff]  ;;  %v377_v8 = vld [vmem:[%s2982_s1 + $0xa90] sm:$0xff]  ;;  %v376_v12 = vld [vmem:[%s2982_s1 + $0xa88] sm:$0xff] }
  0xb3   :  { %1642 = vmatpush3.msra.mxu0 %v372_v30  ;;  %1677 = vmatpush3.msra.mxu1 %v404_v31  ;;  %v409_v9 = vld [vmem:[%s2982_s1 + $0xb90] sm:$0xff]  ;;  %v408_v13 = vld [vmem:[%s2982_s1 + $0xb88] sm:$0xff]  ;;  %v375_v16 = vld [vmem:[%s2982_s1 + $0xa80] sm:$0xff] }
  0xb4   :  { %1643 = vmatprep.subr.mxu0 %v387_v32  ;;  %1678 = vmatprep.subr.mxu1 %v419_v33  ;;  %v361_v10 = vld [vmem:[%s2982_s1 + $0xa10] sm:$0xff]  ;;  %v360_v14 = vld [vmem:[%s2982_s1 + $0xa08] sm:$0xff]  ;;  %v407_v17 = vld [vmem:[%s2982_s1 + $0xb80] sm:$0xff] }
  0xb5   :  { %1644 = vmatpush3.msra.mxu0 %v371_v34  ;;  %1679 = vmatpush3.msra.mxu1 %v403_v35  ;;  %v393_v11 = vld [vmem:[%s2982_s1 + $0xb10] sm:$0xff]  ;;  %v392_v15 = vld [vmem:[%s2982_s1 + $0xb08] sm:$0xff]  ;;  %v359_v18 = vld [vmem:[%s2982_s1 + $0xa00] sm:$0xff] }
  0xb6   :  { %1645 = vmatprep.subr.mxu0 %v386_v36  ;;  %1680 = vmatprep.subr.mxu1 %v418_v37  ;;  %v36_v19 = vld [vmem:[%s2981_s0 + $0xa8] sm:$0xff]  ;;  %v391_v20 = vld [vmem:[%s2982_s1 + $0xb00] sm:$0xff]  ;;  %v38_v21 = vld [vmem:[%s2981_s0 + $0xb8] sm:$0xff] }
  0xb7   :  { %1646 = vmatpush3.msra.mxu0 %v370_v38  ;;  %1681 = vmatpush3.msra.mxu1 %v402_v39  ;;  %v35_v22 = vld [vmem:[%s2981_s0 + $0xa0] sm:$0xff]  ;;  %v37_v23 = vld [vmem:[%s2981_s0 + $0xb0] sm:$0xff]  ;;  %s1730_s0 = smov [#allocation2]  }
  0xb8   :  { %1647 = vmatprep.subr.mxu0 %v385_v40  ;;  %1682 = vmatprep.subr.mxu1 %v417_v41  ;;  %v1286_v29 = vld [vmem:[%s2983_s2] ss:$0 sm:$0xff]  ;;  %s1278_s2 = sshll.u32 %s1730_s0, 4  ;;  %s1279_s2 = int_to_ptr.vmem [resolvable:$true] %s1278_s2 }
  0xb9   :  { %1648 = vmatpush3.msra.mxu0 %v369_v42  ;;  %1683 = vmatpush3.msra.mxu1 %v401_v43  ;;  %s1708_s19 = scalar_lea.vmem %s1279_s2, 128  ;;  %p1713_p1 = scmp.lt.s32.totalorder %s1279_s2, %s1279_s2 }
  0xba   :  { %1649 = vmatprep.subr.mxu0 %v384_v44  ;;  %1684 = vmatprep.subr.mxu1 %v416_v45  ;;  %p1709_p0 = scmp.ne.s32.totalorder %s1279_s2, %s1708_s19  ;;  %p1714_p2 = scmp.lt.s32.totalorder %s1708_s19, %s1708_s19 }
  0xbb   :  { %1650 = vmatpush3.msra.mxu0 %v368_v46  ;;  %1685 = vmatpush3.msra.mxu1 %v400_v47 }
  0xbc   :  { %1651 = vmatprep.subr.mxu0 %v383_v48  ;;  %1686 = vmatprep.subr.mxu1 %v415_v49  ;;  %p1715_p3 = por %p1714_p2, %p1713_p1 }
  0xbd   :  { %1652 = vmatpush3.msra.mxu0 %v367_v50  ;;  %1687 = vmatpush3.msra.mxu1 %v399_v51 }
  0xbe   :  { %1653 = vmatprep.subr.mxu0 %v382_v52  ;;  %1688 = vmatprep.subr.mxu1 %v414_v53  ;;  %p1716_p4 = pnand %p1715_p3, %p1709_p0 }
  0xbf   :  { %1654 = vmatpush3.msra.mxu0 %v366_v54  ;;  %1689 = vmatpush3.msra.mxu1 %v398_v55 }
  0xc0   :  { %1655 = vmatprep.subr.mxu0 %v381_v56  ;;  %1690 = vmatprep.subr.mxu1 %v413_v57 }
  0xc1   :  { %1656 = vmatpush3.msra.mxu0 %v365_v58  ;;  %1691 = vmatpush3.msra.mxu1 %v397_v59 }
  0xc2   :  { %1657 = vmatprep.subr.mxu0 %v380_v60  ;;  %1692 = vmatprep.subr.mxu1 %v412_v61 }
  0xc3   :  { %1658 = vmatpush3.msra.mxu0 %v364_v62  ;;  %1693 = vmatpush3.msra.mxu1 %v396_v63 }
  0xc4   :  { %1659 = vmatprep.subr.mxu0 %v379_v0  ;;  %1694 = vmatprep.subr.mxu1 %v411_v1 }
  0xc5   :  { %1660 = vmatpush3.msra.mxu0 %v363_v2  ;;  %1695 = vmatpush3.msra.mxu1 %v395_v3 }
  0xc6   :  { %1661 = vmatprep.subr.mxu0 %v378_v4  ;;  %1696 = vmatprep.subr.mxu1 %v410_v5 }
  0xc7   :  { %1662 = vmatpush3.msra.mxu0 %v362_v6  ;;  %1697 = vmatpush3.msra.mxu1 %v394_v7 }
  0xc8   :  { %1663 = vmatprep.subr.mxu0 %v377_v8  ;;  %1698 = vmatprep.subr.mxu1 %v409_v9 }
  0xc9   :  { %1664 = vmatpush3.msra.mxu0 %v361_v10  ;;  %1699 = vmatpush3.msra.mxu1 %v393_v11 }
  0xca   :  { %1665 = vmatprep.subr.mxu0 %v376_v12  ;;  %1700 = vmatprep.subr.mxu1 %v408_v13 }
  0xcb   :  { %1666 = vmatpush3.msra.mxu0 %v360_v14  ;;  %1701 = vmatpush3.msra.mxu1 %v392_v15 }
  0xcc   :  { %1667 = vmatprep.subr.mxu0 %v375_v16  ;;  %1702 = vmatprep.subr.mxu1 %v407_v17 }
  0xcd   :  { %1668 = vmatpush3.msra.mxu0 %v359_v18  ;;  %1194 = vmatprep.mubr.f32.mxu0 %v36_v19 }
  0xce   :  { %1703 = vmatpush3.msra.mxu1 %v391_v20  ;;  %1264 = vmatprep.mubr.f32.mxu1 %v38_v21 }
  0xcf   :  { %1195 = vmatmul.mubr.f32.vlgmr.msra.gmra.mxu0 %v35_v22  ;;  %1265 = vmatmul.mubr.f32.vlgmr.msra.gmra.mxu1 %v37_v23 }
  0xe4   :  { %v1319_v24 = vpop.f32.mrf.mxu0 }
  0xe6   :  { %v1354_v25 = vpop.f32.mrf.mxu1  ;;  %v1320_v26 = vpop.f32.mrf.mxu0 }
  0xe7   :  { %v1321_v28 = vadd.f32 %v1320_v26, %v1319_v24 }
  0xe8   :  { %v1355_v30 = vpop.f32.mrf.mxu1 }
  0xe9   :  { %v497_v33 = vadd.f32 %v1321_v28, %v1286_v29  ;;  %v1356_v34 = vadd.f32 %v1355_v30, %v1354_v25 }
  0xeb   :  { %v567_v38 = vadd.f32 %v1356_v34, %v497_v33 }
 0x106   :  { %v1389_v27 = vpop.f32.mrf.mxu0 }
 0x108   :  { %v1424_v31 = vpop.f32.mrf.mxu1  ;;  %v1390_v32 = vpop.f32.mrf.mxu0 }
 0x109   :  { %v1391_v36 = vadd.f32 %v1390_v32, %v1389_v27 }
 0x10a   :  { %v1425_v37 = vpop.f32.mrf.mxu1 }
 0x10b   :  { %v637_v41 = vadd.f32 %v1391_v36, %v567_v38  ;;  %v1426_v42 = vadd.f32 %v1425_v37, %v1424_v31 }
 0x10d   :  { %v707_v46 = vadd.f32 %v1426_v42, %v637_v41 }
 0x128   :  { %v1459_v35 = vpop.f32.mrf.mxu0 }
 0x12a   :  { %v1494_v39 = vpop.f32.mrf.mxu1  ;;  %v1460_v40 = vpop.f32.mrf.mxu0 }
 0x12b   :  { %v1461_v44 = vadd.f32 %v1460_v40, %v1459_v35 }
 0x12c   :  { %v1495_v45 = vpop.f32.mrf.mxu1 }
 0x12d   :  { %v777_v49 = vadd.f32 %v1461_v44, %v707_v46  ;;  %v1496_v50 = vadd.f32 %v1495_v45, %v1494_v39 }
 0x12f   :  { %v847_v54 = vadd.f32 %v1496_v50, %v777_v49 }
 0x14a   :  { %v1529_v43 = vpop.f32.mrf.mxu0 }
 0x14c   :  { %v1564_v47 = vpop.f32.mrf.mxu1  ;;  %v1530_v48 = vpop.f32.mrf.mxu0 }
 0x14d   :  { %v1531_v52 = vadd.f32 %v1530_v48, %v1529_v43 }
 0x14e   :  { %v1565_v53 = vpop.f32.mrf.mxu1 }
 0x14f   :  { %v917_v57 = vadd.f32 %v1531_v52, %v847_v54  ;;  %v1566_v58 = vadd.f32 %v1565_v53, %v1564_v47 }
 0x151   :  { %v987_v61 = vadd.f32 %v1566_v58, %v917_v57 }
 0x16c   :  { %v1599_v51 = vpop.f32.mrf.mxu0 }
 0x16e   :  { %v1634_v55 = vpop.f32.mrf.mxu1  ;;  %v1600_v56 = vpop.f32.mrf.mxu0 }
 0x16f   :  { %v1601_v59 = vadd.f32 %v1600_v56, %v1599_v51 }
 0x170   :  { %v1635_v60 = vpop.f32.mrf.mxu1 }
 0x171   :  { %v1057_v62 = vadd.f32 %v1601_v59, %v987_v61  ;;  %v1636_v63 = vadd.f32 %v1635_v60, %v1634_v55 }
 0x173   :  { %v1127_v4 = vadd.f32 %v1636_v63, %v1057_v62 }
 0x18f   :  { %v1669_v0 = vpop.f32.mrf.mxu0  ;;  %v1704_v1 = vpop.f32.mrf.mxu1 }
 0x191   :  { %v1670_v2 = vpop.f32.mrf.mxu0  ;;  %v1705_v3 = vpop.f32.mrf.mxu1 }
 0x192   :  { %v1671_v5 = vadd.f32 %v1670_v2, %v1669_v0  ;;  %v1706_v7 = vadd.f32 %v1705_v3, %v1704_v1 }
 0x194   :  { %v1197_v6 = vadd.f32 %v1671_v5, %v1127_v4 }
 0x196   :  { %v1267_v8 = vadd.f32 %v1706_v7, %v1197_v6 }
 0x198   :  { %1271 = vst.msk [vmem:[#allocation2] sm:$0xff] %vm1270_vm0, %v1267_v8 }
 0x199   :  { %1719 = shalt.err (!%p1716_p4)
}
 0x19a   :  { %1281 = dma.vmem_to_hbm [thread:$0]  %s1279_s2, 128, %s2984_s3, [#allocation3]  }
 0x19b   :  { %1728 = dma.done.wait [#allocation3], 128  }
 0x19c   :  { %1729 = vsyncadd [#allocation3], 4294967168 }
 0x19d   :  { %1285 = vsyncpa [#allocation3], 1 }

</bundles_post_ra>
